<compile_context>
chip_gen: v7x
topology: tpu7x:2x2x1
jax: 0.10.0
libtpu: 0.0.40
codegen_flags: <defaults>
</compile_context>

<pallas_src>
import math

import jax
import jax.numpy as jnp
from jax.experimental import pallas as pl
from jax.experimental.pallas import tpu as pltpu


# -----------------------------------------------------------------------------
# Kernel body
# -----------------------------------------------------------------------------
def ffn_kernel(x_ref, w1_ref, b1_ref, w2_ref, b2_ref, o_ref, acc_ref):
    """One (TM, dim) row tile of x against one TH chunk of the hidden dim."""
    k = pl.program_id(1)

    @pl.when(k == 0)
    def _():
        # Fold the second bias into the accumulator init (free bias add).
        acc_ref[...] = jnp.broadcast_to(
            b2_ref[...].astype(jnp.float32), acc_ref.shape)

    # First matmul + bias + ReLU on a (TM, TH) slab of the hidden activation.
    h = jnp.dot(x_ref[...], w1_ref[...], preferred_element_type=jnp.float32)
    h = jnp.maximum(h + b1_ref[...].astype(jnp.float32), 0.0)
    # TODO(synk): dropout with p>0 would need pltpu.prng_random_bits masking;
    # the module default p=0.0 is an exact identity and is folded away.

    # Partial second matmul, accumulated in f32 VMEM scratch.
    acc_ref[...] += jnp.dot(h.astype(w2_ref.dtype), w2_ref[...],
                            preferred_element_type=jnp.float32)

    @pl.when(k == pl.num_programs(1) - 1)
    def _():
        o_ref[...] = acc_ref[...].astype(o_ref.dtype)


# -----------------------------------------------------------------------------
# Generation-aware sizing helpers
# -----------------------------------------------------------------------------
def _cdiv(a, b):
    return -(-a // b)


def _round_up(x, m):
    return _cdiv(x, m) * m


def _detect_tpu():
    """Returns (tm_cap, th_align, usable_vmem_bytes, two_cores)."""
    kind = ""
    try:
        kind = jax.devices()[0].device_kind.lower()
    except Exception:
        pass

    vmem_cap = None
    try:
        vmem_cap = int(pltpu.get_tpu_info().vmem_capacity_bytes)
    except Exception:
        pass

    if "v7" in kind:
        tm_cap, th_align, vmem_default, two_cores = 384, 256, 64 << 20, True
    elif "v6" in kind:
        tm_cap, th_align, vmem_default, two_cores = 512, 256, 128 << 20, False
    elif "v5" in kind:
        tm_cap, th_align, vmem_default, two_cores = 256, 128, 128 << 20, False
    else:  # unknown / CPU interpret — be conservative
        tm_cap, th_align, vmem_default, two_cores = 256, 128, 64 << 20, False

    if vmem_cap is None or vmem_cap <= 0:
        vmem_cap = vmem_default
    # ~18% headroom for Mosaic internal scratch / spill buffers.
    usable = int(vmem_cap * 0.82)
    return tm_cap, th_align, usable, two_cores


# -----------------------------------------------------------------------------
# Wrapper
# -----------------------------------------------------------------------------
def feed_forward(x, w1, b1, w2, b2, *, tm=None, th=None, vmem_limit_bytes=None):
    """x: (batch, seq, dim); w1:(dim,hidden), b1:(1,hidden), w2:(hidden,dim),
    b2:(1,dim). Returns (batch, seq, dim)."""
    batch, seq, dim = x.shape
    hidden = w1.shape[1]
    m = batch * seq
    x2d = x.reshape(m, dim)

    tm_cap, th_align, vmem_usable, two_cores = _detect_tpu()
    x_item = jnp.dtype(x.dtype).itemsize
    w_item = jnp.dtype(w1.dtype).itemsize

    # ---- row-tile (TM) selection -------------------------------------------
    if tm is None:
        n_tiles = _cdiv(m, tm_cap) if m > tm_cap else 1
        # On 2-TensorCore chips, make sure both cores get a row tile when M is
        # large enough for the split to be worth the extra grid step.
        if two_cores and n_tiles == 1 and m >= 256:
            n_tiles = 2
        tm = _round_up(_cdiv(m, n_tiles), 8)
    tm = max(8, tm)

    # ---- hidden-chunk (TH) selection, VMEM-budgeted -------------------------
    if th is None:
        # Fixed (TH-independent) residents: double-buffered x and out tiles,
        # the f32 accumulator, b2, plus a misc cushion.
        fixed = (2 * tm * dim * x_item          # x tile, double-buffered
                 + 2 * tm * dim * x_item        # out tile, double-buffered
                 + tm * dim * 4                 # f32 accumulator scratch
                 + 2 * dim * w_item             # b2
                 + (1 << 20))
        # Per-TH bytes: double-buffered w1 column slab + w2 row slab + b1,
        # plus the compiler-materialized h temps (f32 result + recast copy).
        per_th = (4 * dim * w_item
                  + 2 * w_item
                  + tm * (4 + w_item))
        avail = max(vmem_usable - fixed, per_th * th_align)
        th = max(th_align, (avail // per_th) // th_align * th_align)
        th = min(th, _round_up(hidden, th_align))
    th = max(th_align if th is None else 8, th)

    # ---- pad M and hidden so the grid divides exactly (zero padding of the
    # hidden dim is exact: ReLU(0)=0 and the padded w2 rows are zero) ---------
    m_pad = _round_up(m, tm)
    h_pad = _round_up(hidden, th)
    if m_pad != m:
        x2d = jnp.pad(x2d, ((0, m_pad - m), (0, 0)))
    if h_pad != hidden:
        w1 = jnp.pad(w1, ((0, 0), (0, h_pad - hidden)))
        b1 = jnp.pad(b1, ((0, 0), (0, h_pad - hidden)))
        w2 = jnp.pad(w2, ((0, h_pad - hidden), (0, 0)))

    grid = (m_pad // tm, h_pad // th)           # reduction axis last

    # ---- explicit scoped-VMEM limit -----------------------------------------
    if vmem_limit_bytes is None:
        est = (4 * dim * th * w_item + 2 * th * w_item + 2 * dim * w_item
               + 4 * tm * dim * x_item + tm * dim * 4
               + tm * th * (4 + w_item))
        vmem_limit_bytes = min(vmem_usable, max(int(est * 1.3) + (4 << 20),
                                                32 << 20))

    # ---- cost hint: weights are re-streamed once per row tile ---------------
    n_row_tiles = grid[0]
    weight_bytes = (w1.size + w2.size + b1.size + b2.size) * w_item
    bytes_accessed = (m_pad * dim * x_item          # x read
                      + m_pad * dim * x_item        # out write
                      + n_row_tiles * weight_bytes)  # re-streamed weights
    flops = 4 * m_pad * dim * h_pad                 # two matmuls

    out2d = pl.pallas_call(
        ffn_kernel,
        out_shape=jax.ShapeDtypeStruct((m_pad, dim), x.dtype),
        grid_spec=pltpu.PrefetchScalarGridSpec(
            num_scalar_prefetch=0,
            grid=grid,
            in_specs=[
                pl.BlockSpec((tm, dim), lambda i, k: (i, 0)),   # x row tile
                pl.BlockSpec((dim, th), lambda i, k: (0, k)),   # w1 hidden slab
                pl.BlockSpec((1, th),   lambda i, k: (0, k)),   # b1 slab
                pl.BlockSpec((th, dim), lambda i, k: (k, 0)),   # w2 hidden slab
                pl.BlockSpec((1, dim),  lambda i, k: (0, 0)),   # b2 (resident)
            ],
            out_specs=pl.BlockSpec((tm, dim), lambda i, k: (i, 0)),
            scratch_shapes=[pltpu.VMEM((tm, dim), jnp.float32)],
        ),
        compiler_params=pltpu.CompilerParams(
            dimension_semantics=("parallel", "arbitrary"),
            vmem_limit_bytes=int(vmem_limit_bytes)),
        cost_estimate=pl.CostEstimate(
            flops=flops, transcendentals=0, bytes_accessed=int(bytes_accessed)),
    )(x2d, w1, b1, w2, b2)

    return out2d[:m].reshape(batch, seq, dim)


# -----------------------------------------------------------------------------
# Parameter init (matches nn.Linear defaults; weights stored as W.T)
# -----------------------------------------------------------------------------
def init_params(key, dim, hidden_dim, dtype=jnp.float32):
    k1, k2, k3, k4 = jax.random.split(key, 4)
    bound1 = 1.0 / math.sqrt(dim)
    bound2 = 1.0 / math.sqrt(hidden_dim)
    w1 = jax.random.uniform(k1, (dim, hidden_dim), dtype, -bound1, bound1)
    b1 = jax.random.uniform(k2, (1, hidden_dim), dtype, -bound1, bound1)
    w2 = jax.random.uniform(k3, (hidden_dim, dim), dtype, -bound2, bound2)
    b2 = jax.random.uniform(k4, (1, dim), dtype, -bound2, bound2)
    return w1, b1, w2, b2


def _ref_ffn(x, w1, b1, w2, b2):
    m = x.shape[0] * x.shape[1]
    dim = x.shape[2]
    h = jnp.maximum(x.reshape(m, dim) @ w1 + b1, 0.0)
    return (h @ w2 + b2).reshape(x.shape)


if __name__ == "__main__":
    key = jax.random.PRNGKey(0)
    kx, kp, kx2, kp2, kx3, kp3 = jax.random.split(key, 6)

    # --- test 1: tiny shapes (hidden gets zero-padded to the TH alignment) ---
    batch, seq, dim, hidden_dim = 2, 8, 32, 64
    x = jax.random.normal(kx, (batch, seq, dim), dtype=jnp.float32)
    w1, b1, w2, b2 = init_params(kp, dim, hidden_dim)
    out = jax.block_until_ready(feed_forward(x, w1, b1, w2, b2))
    ref = _ref_ffn(x, w1, b1, w2, b2)
    assert out.shape == (batch, seq, dim)
    assert jnp.allclose(out, ref, atol=1e-5, rtol=1e-5)

    # --- test 2: explicit tiles exercising the (row-tiles, hidden-tiles) grid
    batch, seq, dim, hidden_dim = 2, 64, 128, 256
    x = jax.random.normal(kx2, (batch, seq, dim), dtype=jnp.float32)
    w1, b1, w2, b2 = init_params(kp2, dim, hidden_dim)
    out = jax.block_until_ready(
        feed_forward(x, w1, b1, w2, b2, tm=64, th=128))   # grid = (2, 2)
    ref = _ref_ffn(x, w1, b1, w2, b2)
    assert jnp.allclose(out, ref, atol=1e-4, rtol=1e-4)

    # --- test 3: awkward, non-divisible shapes (M and hidden both padded) ----
    batch, seq, dim, hidden_dim = 3, 11, 128, 200
    x = jax.random.normal(kx3, (batch, seq, dim), dtype=jnp.float32)
    w1, b1, w2, b2 = init_params(kp3, dim, hidden_dim)
    out = jax.block_until_ready(feed_forward(x, w1, b1, w2, b2))
    ref = _ref_ffn(x, w1, b1, w2, b2)
    assert jnp.allclose(out, ref, atol=1e-4, rtol=1e-4)

    # --- test 4: bf16 weights/activations (native MXU rate, f32 accumulate) --
    batch, seq, dim, hidden_dim = 2, 64, 128, 256
    x = jax.random.normal(kx2, (batch, seq, dim), dtype=jnp.float32)
    w1, b1, w2, b2 = init_params(kp2, dim, hidden_dim)
    xb = x.astype(jnp.bfloat16)
    w1b, b1b, w2b, b2b = (t.astype(jnp.bfloat16) for t in (w1, b1, w2, b2))
    outb = jax.block_until_ready(feed_forward(xb, w1b, b1b, w2b, b2b))
    hb = jnp.maximum(
        jnp.dot(xb.reshape(-1, dim), w1b, preferred_element_type=jnp.float32)
        + b1b.astype(jnp.float32), 0.0)
    refb = (jnp.dot(hb.astype(jnp.bfloat16), w2b,
                    preferred_element_type=jnp.float32)
            + b2b.astype(jnp.float32)).reshape(batch, seq, dim)
    assert outb.dtype == jnp.bfloat16
    assert jnp.allclose(outb.astype(jnp.float32), refb, atol=2e-2, rtol=2e-2)

    print("KERNEL_OK")
</pallas_src>

<mosaic_0001>
module attributes {stable_mosaic.version = 11 : i64} {
  func.func @ffn_kernel(%arg0: i32, %arg1: i32, %arg2: memref<16x32xf32, #tpu.memory_space<vmem>>, %arg3: memref<32x128xf32, #tpu.memory_space<vmem>>, %arg4: memref<1x128xf32, #tpu.memory_space<vmem>>, %arg5: memref<128x32xf32, #tpu.memory_space<vmem>>, %arg6: memref<1x32xf32, #tpu.memory_space<vmem>>, %arg7: memref<16x32xf32, #tpu.memory_space<vmem>>, %arg8: memref<16x32xf32, #tpu.memory_space<vmem>>) attributes {dimension_semantics = [#tpu.dimension_semantics<parallel>, #tpu.dimension_semantics<arbitrary>], iteration_bounds = array<i64: 1, 1>, scalar_prefetch = 0 : i64, scratch_operands = 1 : i64, tpu.core_type = #tpu.core_type<tc>, window_params = [{transform_indices = @transform_0, window_bounds = array<i64: 16, 32>}, {transform_indices = @transform_1, window_bounds = array<i64: 32, 128>}, {transform_indices = @transform_2, window_bounds = array<i64: 1, 128>}, {transform_indices = @transform_3, window_bounds = array<i64: 128, 32>}, {pipeline_mode = #tpu.pipeline_mode<synchronous>, transform_indices = @transform_4, window_bounds = array<i64: 1, 32>}, {transform_indices = @transform_5, window_bounds = array<i64: 16, 32>}]} {
    %c0_i32 = arith.constant 0 : i32
    %0 = arith.cmpi eq, %arg1, %c0_i32 : i32
    %1 = arith.extui %0 : i1 to i32
    %c0_i32_0 = arith.constant 0 : i32
    %2 = arith.cmpi ne, %1, %c0_i32_0 : i32
    scf.if %2 {
      %c0_16 = arith.constant 0 : index
      %c0_17 = arith.constant 0 : index
      %19 = vector.load %arg6[%c0_16, %c0_17] : memref<1x32xf32, #tpu.memory_space<vmem>>, vector<1x32xf32>
      %20 = vector.shape_cast %19 : vector<1x32xf32> to vector<1x32xf32>
      %21 = vector.broadcast %20 : vector<1x32xf32> to vector<16x32xf32>
      %c0_18 = arith.constant 0 : index
      %c0_19 = arith.constant 0 : index
      %22 = vector.load %arg8[%c0_18, %c0_19] : memref<16x32xf32, #tpu.memory_space<vmem>>, vector<16x32xf32>
      tpu.vector_store %arg8[%c0_18, %c0_19], %21 {strides = array<i32>} : memref<16x32xf32, #tpu.memory_space<vmem>>, vector<16x32xf32>,
    } else {
    }
    %c0 = arith.constant 0 : index
    %c0_1 = arith.constant 0 : index
    %3 = vector.load %arg2[%c0, %c0_1] : memref<16x32xf32, #tpu.memory_space<vmem>>, vector<16x32xf32>
    %c0_2 = arith.constant 0 : index
    %c0_3 = arith.constant 0 : index
    %4 = vector.load %arg3[%c0_2, %c0_3] : memref<32x128xf32, #tpu.memory_space<vmem>>, vector<32x128xf32>
    %cst = arith.constant dense<0.000000e+00> : vector<16x128xf32>
    %5 = tpu.matmul %3, %4, %cst {dimension_numbers = #tpu.dot_dimension_numbers<[1], [0], [0], [1], [0, 0, 1, 1], [], []>} : vector<16x32xf32>, vector<32x128xf32>, vector<16x128xf32> -> vector<16x128xf32>
    %c0_4 = arith.constant 0 : index
    %c0_5 = arith.constant 0 : index
    %6 = vector.load %arg4[%c0_4, %c0_5] : memref<1x128xf32, #tpu.memory_space<vmem>>, vector<1x128xf32>
    %7 = vector.broadcast %6 : vector<1x128xf32> to vector<16x128xf32>
    %8 = arith.addf %5, %7 : vector<16x128xf32>
    %cst_6 = arith.constant 0.000000e+00 : f32
    %9 = vector.broadcast %cst_6 : f32 to vector<16x128xf32>
    %10 = arith.maximumf %8, %9 : vector<16x128xf32>
    %c0_7 = arith.constant 0 : index
    %c0_8 = arith.constant 0 : index
    %11 = vector.load %arg8[%c0_7, %c0_8] : memref<16x32xf32, #tpu.memory_space<vmem>>, vector<16x32xf32>
    %c0_9 = arith.constant 0 : index
    %c0_10 = arith.constant 0 : index
    %12 = vector.load %arg5[%c0_9, %c0_10] : memref<128x32xf32, #tpu.memory_space<vmem>>, vector<128x32xf32>
    %cst_11 = arith.constant dense<0.000000e+00> : vector<16x32xf32>
    %13 = tpu.matmul %10, %12, %cst_11 {dimension_numbers = #tpu.dot_dimension_numbers<[1], [0], [0], [1], [0, 0, 1, 1], [], []>} : vector<16x128xf32>, vector<128x32xf32>, vector<16x32xf32> -> vector<16x32xf32>
    %14 = arith.addf %11, %13 : vector<16x32xf32>
    %c0_12 = arith.constant 0 : index
    %c0_13 = arith.constant 0 : index
    %15 = vector.load %arg8[%c0_12, %c0_13] : memref<16x32xf32, #tpu.memory_space<vmem>>, vector<16x32xf32>
    tpu.vector_store %arg8[%c0_12, %c0_13], %14 {strides = array<i32>} : memref<16x32xf32, #tpu.memory_space<vmem>>, vector<16x32xf32>,
    %c0_i32_14 = arith.constant 0 : i32
    %16 = arith.cmpi eq, %arg1, %c0_i32_14 : i32
    %17 = arith.extui %16 : i1 to i32
    %c0_i32_15 = arith.constant 0 : i32
    %18 = arith.cmpi ne, %17, %c0_i32_15 : i32
    scf.if %18 {
      %c0_16 = arith.constant 0 : index
      %c0_17 = arith.constant 0 : index
      %19 = vector.load %arg8[%c0_16, %c0_17] : memref<16x32xf32, #tpu.memory_space<vmem>>, vector<16x32xf32>
      %c0_18 = arith.constant 0 : index
      %c0_19 = arith.constant 0 : index
      %20 = vector.load %arg7[%c0_18, %c0_19] : memref<16x32xf32, #tpu.memory_space<vmem>>, vector<16x32xf32>
      tpu.vector_store %arg7[%c0_18, %c0_19], %19 {strides = array<i32>} : memref<16x32xf32, #tpu.memory_space<vmem>>, vector<16x32xf32>,
    } else {
    }
    return
  }
  func.func @transform_0(%arg0: i32, %arg1: i32) -> (i32, i32) {
    %c0_i32 = arith.constant 0 : i32
    %c0_i32_0 = arith.constant 0 : i32
    return %arg0, %c0_i32 : i32, i32
  }
  func.func @transform_1(%arg0: i32, %arg1: i32) -> (i32, i32) {
    %c0_i32 = arith.constant 0 : i32
    %c0_i32_0 = arith.constant 0 : i32
    return %c0_i32, %arg1 : i32, i32
  }
  func.func @transform_2(%arg0: i32, %arg1: i32) -> (i32, i32) {
    %c0_i32 = arith.constant 0 : i32
    %c0_i32_0 = arith.constant 0 : i32
    return %c0_i32, %arg1 : i32, i32
  }
  func.func @transform_3(%arg0: i32, %arg1: i32) -> (i32, i32) {
    %c0_i32 = arith.constant 0 : i32
    %c0_i32_0 = arith.constant 0 : i32
    return %arg1, %c0_i32 : i32, i32
  }
  func.func @transform_4(%arg0: i32, %arg1: i32) -> (i32, i32) {
    %c0_i32 = arith.constant 0 : i32
    %c0_i32_0 = arith.constant 0 : i32
    %c0_i32_1 = arith.constant 0 : i32
    return %c0_i32, %c0_i32_0 : i32, i32
  }
  func.func @transform_5(%arg0: i32, %arg1: i32) -> (i32, i32) {
    %c0_i32 = arith.constant 0 : i32
    %c0_i32_0 = arith.constant 0 : i32
    return %arg0, %c0_i32 : i32, i32
  }
}

</mosaic_0001>

<bundles_post_ra>
// kernel: tpu_custom_call.1
= control target key start
LH: loop header
LB: loop body
LE: loop exit
PB: predicated region body
PF: predicated region fallthrough
CT: control target
= control target key end

     0   :  { %vm32_vm0 = vcmask 261120   ;;  %s518_s0 = inlined_call_operand.vmem [shape: f32[16,32], index: 0, kind: input, shape index: {}]   ;;  %s519_s1 = inlined_call_operand.vmem [shape: f32[32,128], index: 1, kind: input, shape index: {}]   ;;  %s520_s2 = inlined_call_operand.vmem [shape: f32[1,128], index: 2, kind: input, shape index: {}]   ;;  %s521_s3 = inlined_call_operand.vmem [shape: f32[128,32], index: 3, kind: input, shape index: {}]   ;;  %s522_s4 = inlined_call_operand.vmem [shape: f32[1,32], index: 4, kind: input, shape index: {}]   ;;  %s523_s5 = inlined_call_operand.hbm [shape: f32[16,32], index: 5, kind: output, shape index: {}]  }
   0x1   :  { %v37_v0 = vld [vmem:[%s519_s1] sm:$0xff]  ;;  %v38_v1 = vld [vmem:[%s519_s1 + $0x8] sm:$0xff]  ;;  %v39_v2 = vld [vmem:[%s519_s1 + $0x10] sm:$0xff] }
   0x2   :  { %v326_v3 = vpack.c.bf16 %v38_v1, %v37_v0  ;;  %v40_v4 = vld [vmem:[%s519_s1 + $0x18] sm:$0xff]  ;;  %v35_v5 = vld [vmem:[%s518_s0] sm:$0xff]  ;;  %v135_v8 = vld [vmem:[%s521_s3 + $0x8] sm:$0xff] }
   0x3   :  { %v330_v6 = vpack.c.bf16 %v40_v4, %v39_v2  ;;  %288 = vmatprep.mubr.msk.f32.mxu0 %vm32_vm0, %v35_v5  ;;  %v134_v7 = vld [vmem:[%s521_s3] sm:$0xff]  ;;  %v136_v9 = vld [vmem:[%s521_s3 + $0x10] sm:$0xff]  ;;  %v137_v11 = vld [vmem:[%s521_s3 + $0x18] sm:$0xff] }
   0x4   :  { %327 = vmatprep.subr.bf16.mxu0 %v326_v3  ;;  %v334_v10 = vpack.c.bf16 %v135_v8, %v134_v7  ;;  %v338_v12 = vpack.c.bf16 %v137_v11, %v136_v9  ;;  %v138_v13 = vld [vmem:[%s521_s3 + $0x20] sm:$0xff]  ;;  %v139_v14 = vld [vmem:[%s521_s3 + $0x28] sm:$0xff] }
   0x5   :  { %329 = vmatpush3.bf16.msra.mxu0 %v326_v3 }
   0x6   :  { %331 = vmatprep.subr.bf16.mxu0 %v330_v6  ;;  %335 = vmatprep.subr.bf16.mxu1 %v334_v10 }
   0x7   :  { %337 = vmatpush3.bf16.msra.mxu1 %v334_v10 }
   0x8   :  { %10 = vsyncpa [#allocation4], 0  ;;  %339 = vmatprep.subr.bf16.mxu1 %v338_v12  ;;  %v342_v15 = vpack.c.bf16 %v139_v14, %v138_v13  ;;  %v36_v16 = vld [vmem:[%s518_s0 + $0x8] sm:$0xff]  ;;  %v140_v17 = vld [vmem:[%s521_s3 + $0x30] sm:$0xff] }
   0x9   :  { %333 = vmatpush3.bf16.msra.mxu0 %v330_v6  ;;  %v141_v18 = vld [vmem:[%s521_s3 + $0x38] sm:$0xff]  ;;  %v142_v20 = vld [vmem:[%s521_s3 + $0x40] sm:$0xff]  ;;  %v143_v21 = vld [vmem:[%s521_s3 + $0x48] sm:$0xff] }
   0xa   :  { %v346_v19 = vpack.c.bf16 %v141_v18, %v140_v17  ;;  %v350_v22 = vpack.c.bf16 %v143_v21, %v142_v20  ;;  %v144_v23 = vld [vmem:[%s521_s3 + $0x50] sm:$0xff]  ;;  %v145_v24 = vld [vmem:[%s521_s3 + $0x58] sm:$0xff]  ;;  %v146_v26 = vld [vmem:[%s521_s3 + $0x60] sm:$0xff] }
   0xb   :  { %341 = vmatpush3.bf16.msra.mxu1 %v338_v12  ;;  %v354_v25 = vpack.c.bf16 %v145_v24, %v144_v23  ;;  %v147_v27 = vld [vmem:[%s521_s3 + $0x68] sm:$0xff]  ;;  %v148_v29 = vld [vmem:[%s521_s3 + $0x70] sm:$0xff]  ;;  %v149_v30 = vld [vmem:[%s521_s3 + $0x78] sm:$0xff]  ;;  %s393_s3 = smov [#allocation3]  }
   0xc   :  { %289 = vmatmul.mubr.msk.f32.vlgmr.msra.gmra.mrb[0].mxu0 %vm32_vm0, %v36_v16  ;;  %343 = vmatprep.subr.bf16.mxu1 %v342_v15  ;;  %v358_v28 = vpack.c.bf16 %v147_v27, %v146_v26  ;;  %v362_v31 = vpack.c.bf16 %v149_v30, %v148_v29  ;;  %v252_v32 = vld [vmem:[%s522_s4] ss:$0 sm:$0xff] }
   0xd   :  { %34 = vst.msk [vmem:[#allocation2 + $0x8] sm:$0xff] %vm32_vm0, %v252_v32  ;;  %33 = vst.msk [vmem:[#allocation2] sm:$0xff] %vm32_vm0, %v252_v32  ;;  %v253_v33 = vld [vmem:[%s520_s2] ss:$0 sm:$0xff]  ;;  %s241_s2 = sshll.u32 %s393_s3, 4  ;;  %s242_s2 = int_to_ptr.vmem [resolvable:$true] %s241_s2 }
   0xe   :  { %s369_s4 = scalar_lea.vmem %s242_s2, 256  ;;  %p374_p1 = scmp.lt.s32.totalorder %s242_s2, %s242_s2 }
   0xf   :  { %345 = vmatpush3.bf16.msra.mxu1 %v342_v15  ;;  %p370_p0 = scmp.ne.s32.totalorder %s242_s2, %s369_s4  ;;  %p375_p2 = scmp.lt.s32.totalorder %s369_s4, %s369_s4 }
  0x10   :  { %347 = vmatprep.subr.bf16.mxu1 %v346_v19 }
  0x11   :  { %p376_p3 = por %p375_p2, %p374_p1 }
  0x13   :  { %349 = vmatpush3.bf16.msra.mxu1 %v346_v19  ;;  %p377_p4 = pnand %p376_p3, %p370_p0 }
  0x14   :  { %351 = vmatprep.subr.bf16.mxu1 %v350_v22  ;;  %v133_v40 = vld [vmem:[#allocation2 + $0x8] sm:$0xff]  ;;  %v132_v41 = vld [vmem:[#allocation2] sm:$0xff] }
  0x17   :  { %353 = vmatpush3.bf16.msra.mxu1 %v350_v22 }
  0x18   :  { %355 = vmatprep.subr.bf16.mxu1 %v354_v25 }
  0x1b   :  { %357 = vmatpush3.bf16.msra.mxu1 %v354_v25 }
  0x1c   :  { %359 = vmatprep.subr.bf16.mxu1 %v358_v28 }
  0x1f   :  { %361 = vmatpush3.bf16.msra.mxu1 %v358_v28 }
  0x20   :  { %363 = vmatprep.subr.bf16.mxu1 %v362_v31 }
  0x23   :  { %365 = vmatpush3.bf16.msra.mxu1 %v362_v31 }
  0xdf   :  { %v290_v34 = vpop.f32.mrb[0].mxu0 }
  0xe0   :  { %v127_v35 = vadd.f32 %v290_v34, %v253_v33  ;;  %v121_v36 = vpop.f32.mrb[1].mxu0 }
  0xe1   :  { %v122_v37 = vadd.f32 %v253_v33, %v121_v36 }
  0xe2   :  { %v131_v39 = vmax.f32 %v127_v35, 0.0 }
  0xe3   :  { %v130_v38 = vmax.f32 %v122_v37, 0.0 }
  0xe5   :  { %323 = vmatprep.mubr.f32.mxu1 %v130_v38 }
  0xe6   :  { %324 = vmatmul.mubr.f32.vlgmr.msra.gmra.mrb[0].mxu1 %v131_v39 }
 0x1b9   :  { %v325_v42 = vpop.f32.mrb[0].mxu1 }
 0x1ba   :  { %v226_v43 = vadd.f32 %v325_v42, %v133_v40  ;;  %v216_v44 = vpop.f32.mrb[1].mxu1 }
 0x1bb   :  { %v225_v45 = vadd.f32 %v216_v44, %v132_v41 }
 0x1bc   :  { %228 = vst.msk [vmem:[#allocation2 + $0x8] sm:$0xff] %vm32_vm0, %v226_v43 }
 0x1bd   :  { %227 = vst.msk [vmem:[#allocation2] sm:$0xff] %vm32_vm0, %v225_v45 }
 0x1c3   :  { %v233_v46 = vld [vmem:[#allocation2 + $0x8] sm:$0xff] }
 0x1c4   :  { %v232_v47 = vld [vmem:[#allocation2] sm:$0xff]  ;;  %235 = vst.msk [vmem:[#allocation3 + $0x8] sm:$0xff] %vm32_vm0, %v233_v46 }
 0x1c5   :  { %234 = vst.msk [vmem:[#allocation3] sm:$0xff] %vm32_vm0, %v232_v47 }
 0x1c6   :  { %380 = shalt.err (!%p377_p4)
}
 0x1c7   :  { %s381_s15 = scalar_lea.hbm %s523_s5, 256 }
 0x1c8   :  { %p382_p5 = scmp.ne.s32.totalorder %s523_s5, %s381_s15  ;;  %p385_p6 = scmp.lt.u32.totalorder %s381_s15, %s523_s5 }
 0x1ca   :  { %p387_p7 = pnand %p385_p6, %p382_p5 }
 0x1cc   :  { %390 = shalt.err (!%p387_p7)
}
 0x1cd   :  { %s394_s20 = smov 128   ;;  %s395_s21 = smov 8  }
 0x1ce   :  { %247 = dma.vmem_to_hbm [thread:$0]  %s242_s2, 256, %s523_s5, [#allocation4], %s394_s20, %s394_s20, %s395_s21  }
 0x1cf   :  { %391 = dma.done.wait [#allocation4], 256  }
 0x1d0   :  { %392 = vsyncadd [#allocation4], 4294967040 }
 0x1d1   :  { %251 = vsyncpa [#allocation4], 1 }

</bundles_post_ra>
